<compile_context>
chip_gen: v6e
topology: v6e:2x2x1
jax: 0.10.0
libtpu: 0.0.40
codegen_flags: <defaults>
</compile_context>

<pallas_src>
import functools

import jax
import jax.numpy as jnp
from jax.experimental import pallas as pl
from jax.experimental.pallas import tpu as pltpu

GAMMA = 2.0        # module default
ALPHA = 0.25       # module default (unused in the module's forward; kept for parity)
POS_WEIGHT = None  # module default -> weight = target + 2.0

LANES = 128
ROW_ALIGN = 16          # tile-row alignment valid for both f32 (8) and bf16 (16) sublane tiles
MAX_TILE_ROWS = 8192    # (8192,128) f32 = 4 MiB per input block
CHUNK_ROWS = 1024       # in-kernel compute chunk (0.5 MiB f32 intermediates)


def _num_tensorcores():
    """Best-effort count of TensorCores that a 'parallel' grid axis can use."""
    try:
        kind = jax.devices()[0].device_kind.lower()
    except Exception:
        return 1
    # Multi-TC-per-JAX-device parts: megacore v4 / v5p, and v7x (2 TCs/chip).
    if ("v4" in kind) or ("v5p" in kind) or ("7" in kind):
        return 2
    return 1


def _focal_sum_kernel(x_ref, t_ref, out_ref, acc_ref, *, rows, gamma, tile_rows,
                      chunk_rows, total_blocks, blocks_per_core,
                      binary_targets, pos_weight):
    c = pl.program_id(0)          # core-split axis ("parallel")
    i = pl.program_id(1)          # reduction axis ("arbitrary")
    b = c * blocks_per_core + i   # logical row-block id

    @pl.when(i == 0)
    def _init():
        acc_ref[...] = jnp.zeros_like(acc_ref)

    def _loss(xs, ts):
        x = xs.astype(jnp.float32)
        t = ts.astype(jnp.float32)

        # weight = target + 2.0  (pos_weight None, weight arg None), else pos_weight form.
        if pos_weight is not None:
            weight = t * (float(pos_weight) - 1.0) + 1.0
        else:
            weight = t + 2.0

        # BCE-with-logits. Exact rewrite of the module's
        #   x - x*t + max(-x,0) + log(exp(-max_val) + exp(-x - max_val))
        # whose log term equals log1p(exp(-|x|)) for both signs of x.
        e_abs = jnp.exp(-jnp.abs(x))
        sp_x = jnp.log1p(e_abs)
        bce = x - x * t + jnp.maximum(-x, 0.0) + sp_x

        # focal = exp(gamma * logsigmoid(-z)) = sigmoid(-z)**gamma,  z = x*(2t-1).
        z = x * (t * 2.0 - 1.0)
        if binary_targets and gamma == 2.0:
            # For t in {0,1}: |z| == |x|, so sigmoid(-z) reuses e_abs.
            #   sigmoid(-z) = where(z > 0, e_abs, 1) / (1 + e_abs)
            # Squaring replaces the second EUP exp with a cheap divide (exact).
            sig = jnp.where(z > 0.0, e_abs, 1.0) / (1.0 + e_abs)
            focal = sig * sig
        elif binary_targets:
            # |z| == |x| -> softplus(z) reuses sp_x (saves exp+log vs general path).
            focal = jnp.exp(-gamma * (jnp.maximum(z, 0.0) + sp_x))
        else:
            focal = jnp.exp(-gamma * (jnp.maximum(z, 0.0)
                                      + jnp.log1p(jnp.exp(-jnp.abs(z)))))
        return focal * bce * weight

    def _accum(val, nrows):
        # Pure vreg adds on the VPU into the (8, LANES) accumulator.
        acc_ref[...] += val.reshape(nrows // 8, 8, LANES).sum(axis=0)

    def _process_block(valid_rows):
        # valid_rows is a Python int (1..tile_rows): fully-invalid chunks are
        # skipped at trace time, fully-valid chunks pay no mask work, and only
        # the single straddling chunk does a row-iota compare + select.
        for r0 in range(0, tile_rows, chunk_rows):
            if r0 >= valid_rows:
                break
            nrows = min(chunk_rows, tile_rows - r0)
            xs = x_ref[pl.ds(r0, nrows), :]
            ts = t_ref[pl.ds(r0, nrows), :]
            loss = _loss(xs, ts)
            if r0 + nrows > valid_rows:
                row = jax.lax.broadcasted_iota(jnp.int32, (nrows, LANES), 0)
                # NOTE: the select must stay the last op on `loss` so stale-VMEM
                # garbage in the partial last block never reaches the accumulator.
                loss = jnp.where(row < (valid_rows - r0), loss, 0.0)
            _accum(loss, nrows)

    last_block_rows = rows - (total_blocks - 1) * tile_rows  # Python int in [1, tile_rows]

    if last_block_rows == tile_rows:
        # Every data block is full; overhang (clamped) steps skip compute entirely.
        @pl.when(b < total_blocks)
        def _all_full():
            _process_block(tile_rows)
    else:
        @pl.when(b < total_blocks - 1)
        def _full():
            _process_block(tile_rows)

        @pl.when(b == total_blocks - 1)
        def _tail():
            _process_block(last_block_rows)

    # Single cross-lane reduction + scalar store, once per core.
    @pl.when(i == pl.num_programs(1) - 1)
    def _finalize():
        out_ref[0, 0] = jnp.sum(acc_ref[...])


def _focal_elementwise(x, t, gamma, pos_weight):
    """Literal per-element translation of the PyTorch module (float32)."""
    x = x.astype(jnp.float32)
    t = t.astype(jnp.float32)
    if pos_weight is not None:
        weight = t * (float(pos_weight) - 1.0) + 1.0
    else:
        weight = t + 2.0
    max_val = jnp.maximum(-x, 0.0)
    loss = x - x * t + max_val + jnp.log(jnp.exp(-max_val) + jnp.exp(-x - max_val))
    invprobs = jax.nn.log_sigmoid(-x * (t * 2.0 - 1.0))
    return jnp.exp(invprobs * float(gamma)) * loss * weight


def binary_focal_loss(logits, targets, gamma=GAMMA, pos_weight=POS_WEIGHT,
                      assume_binary_targets=True, max_tile_rows=MAX_TILE_ROWS):
    """Equivalent of BinaryFocalLoss(gamma, pos_weight)(logits, targets, reduction=True).

    assume_binary_targets=True enables transcendental reuse that is exact only
    for targets in {0,1}; pass False for soft / label-smoothed targets.
    """
    x = jnp.ravel(logits)
    t = jnp.ravel(targets)
    n = x.shape[0]

    # Keep the target HBM stream narrow: bool/int -> bfloat16 (exact for {0,1}).
    if not jnp.issubdtype(t.dtype, jnp.floating):
        t = t.astype(jnp.bfloat16)
    if not jnp.issubdtype(x.dtype, jnp.floating):
        x = x.astype(jnp.float32)

    rows = n // LANES
    if rows < ROW_ALIGN:
        # Tiny input: not worth a kernel launch.
        return jnp.mean(_focal_elementwise(x, t, gamma, pos_weight))

    n_bulk = rows * LANES
    xb = x if n_bulk == n else x[:n_bulk]
    tb = t if n_bulk == n else t[:n_bulk]
    x2 = xb.reshape(rows, LANES)   # contiguous reshape: free, no pad copy
    t2 = tb.reshape(rows, LANES)

    tile_rows = max(ROW_ALIGN, min(int(max_tile_rows), (rows // ROW_ALIGN) * ROW_ALIGN))
    chunk_rows = min(CHUNK_ROWS, tile_rows)
    total_blocks = pl.cdiv(rows, tile_rows)
    # 2-way split only where it can actually use a second TensorCore.
    ncores = 2 if (total_blocks > 1 and _num_tensorcores() > 1) else 1
    blocks_per_core = pl.cdiv(total_blocks, ncores)
    grid = (ncores, blocks_per_core)

    def block_map(c, i):
        # Clamp so any overhang step (from the core split) re-reads the last
        # valid block; the kernel skips all compute for those steps.
        return (jnp.minimum(c * blocks_per_core + i, total_blocks - 1), 0)

    kernel = functools.partial(
        _focal_sum_kernel,
        rows=rows, gamma=float(gamma), tile_rows=tile_rows, chunk_rows=chunk_rows,
        total_blocks=total_blocks, blocks_per_core=blocks_per_core,
        binary_targets=assume_binary_targets, pos_weight=pos_weight)

    partials = pl.pallas_call(
        kernel,
        out_shape=jax.ShapeDtypeStruct((ncores, 1), jnp.float32),
        grid_spec=pltpu.PrefetchScalarGridSpec(
            num_scalar_prefetch=0,
            grid=grid,
            in_specs=[
                pl.BlockSpec((tile_rows, LANES), block_map),
                pl.BlockSpec((tile_rows, LANES), block_map),
            ],
            out_specs=pl.BlockSpec((1, 1), lambda c, i: (c, 0),
                                   memory_space=pltpu.SMEM),
            scratch_shapes=[pltpu.VMEM((8, LANES), jnp.float32)],
        ),
        compiler_params=pltpu.CompilerParams(
            dimension_semantics=("parallel", "arbitrary"),
            # Pipeline buffers: <= 2 * 2 * 4 MiB = 16 MiB; chunked compute keeps
            # intermediates small. 32 MiB fits v5e/v6e (128 MiB) and v7x (64 MiB).
            vmem_limit_bytes=32 * 1024 * 1024,
        ),
    )(x2, t2)

    total = jnp.sum(partials)
    if n_bulk != n:
        # Ragged (<128-element) remainder folded in with plain jnp — avoids any
        # wrapper-side pad copy of the big arrays.
        total = total + jnp.sum(_focal_elementwise(x[n_bulk:], t[n_bulk:],
                                                   gamma, pos_weight))
    return total / jnp.float32(n)


def binary_focal_loss_ref(logits, targets, gamma=GAMMA, pos_weight=POS_WEIGHT):
    """Pure-JAX reference, literal translation of the PyTorch module."""
    x = jnp.ravel(logits)
    t = jnp.ravel(targets)
    return jnp.mean(_focal_elementwise(x, t, gamma, pos_weight))


def _check(out, ref):
    out = jax.block_until_ready(out)
    ref = jax.block_until_ready(ref)
    assert jnp.allclose(out, ref, rtol=1e-5, atol=1e-6), (out, ref)


if __name__ == "__main__":
    key = jax.random.PRNGKey(0)
    ks = jax.random.split(key, 8)

    # 1) Module-sized test: logits NCHW [2,4,16,16], bool targets (narrow-dtype path).
    x = jax.random.normal(ks[0], (2, 4, 16, 16), dtype=jnp.float32)
    t_bool = jax.random.uniform(ks[1], (2, 4, 16, 16)) > 0.5
    _check(binary_focal_loss(x, t_bool), binary_focal_loss_ref(x, t_bool))

    # 2) Unaligned size + tiny tile -> multi-block grid, partial tail block mask,
    #    and the <128-element ragged remainder folded in the wrapper.
    xu = jax.random.normal(ks[2], (3, 5, 17, 19), dtype=jnp.float32)
    tu = (jax.random.uniform(ks[3], (3, 5, 17, 19)) > 0.5).astype(jnp.float32)
    _check(binary_focal_loss(xu, tu, max_tile_rows=16), binary_focal_loss_ref(xu, tu))

    # 3) Larger aligned input with bf16 targets, default (large) tiles.
    xl = jax.random.normal(ks[4], (2, 4, 128, 128), dtype=jnp.float32)
    tl = (jax.random.uniform(ks[5], (2, 4, 128, 128)) > 0.5).astype(jnp.bfloat16)
    _check(binary_focal_loss(xl, tl), binary_focal_loss_ref(xl, tl))

    # 4) Soft targets -> fully general (non-binary) focal path.
    ts = jax.random.uniform(ks[6], (2, 4, 16, 16), dtype=jnp.float32)
    _check(binary_focal_loss(x, ts, assume_binary_targets=False),
           binary_focal_loss_ref(x, ts))

    # 5) Non-default gamma and scalar pos_weight (binary path without gamma==2 rewrite).
    tf = t_bool.astype(jnp.float32)
    _check(binary_focal_loss(x, tf, gamma=1.5, pos_weight=3.0),
           binary_focal_loss_ref(x, tf, gamma=1.5, pos_weight=3.0))

    print("KERNEL_OK")
</pallas_src>

<mosaic_0001>
module attributes {stable_mosaic.version = 11 : i64} {
  func.func @_focal_sum_kernel(%arg0: i32, %arg1: i32, %arg2: memref<16x128xf32, #tpu.memory_space<vmem>>, %arg3: memref<16x128xbf16, #tpu.memory_space<vmem>>, %arg4: memref<1x1xf32, #tpu.memory_space<smem>>, %arg5: memref<8x128xf32, #tpu.memory_space<vmem>>) attributes {dimension_semantics = [#tpu.dimension_semantics<parallel>, #tpu.dimension_semantics<arbitrary>], iteration_bounds = array<i64: 1, 1>, scalar_prefetch = 0 : i64, scratch_operands = 1 : i64, tpu.core_type = #tpu.core_type<tc>, window_params = [{transform_indices = @transform_0, window_bounds = array<i64: 16, 128>}, {transform_indices = @transform_1, window_bounds = array<i64: 16, 128>}, {transform_indices = @transform_2, window_bounds = array<i64: 1, 1>}]} {
    %c1_i32 = arith.constant 1 : i32
    %0 = arith.muli %arg0, %c1_i32 : i32
    %1 = arith.addi %0, %arg1 : i32
    %c0_i32 = arith.constant 0 : i32
    %2 = arith.cmpi eq, %arg1, %c0_i32 : i32
    %3 = arith.extui %2 : i1 to i32
    %c0_i32_0 = arith.constant 0 : i32
    %4 = arith.cmpi ne, %3, %c0_i32_0 : i32
    scf.if %4 {
      %cst = arith.constant 0.000000e+00 : f32
      %11 = vector.broadcast %cst : f32 to vector<8x128xf32>
      %c0 = arith.constant 0 : index
      %c0_5 = arith.constant 0 : index
      %12 = vector.load %arg5[%c0, %c0_5] : memref<8x128xf32, #tpu.memory_space<vmem>>, vector<8x128xf32>
      tpu.vector_store %arg5[%c0, %c0_5], %11 {strides = array<i32>} : memref<8x128xf32, #tpu.memory_space<vmem>>, vector<8x128xf32>,
    } else {
    }
    %c1_i32_1 = arith.constant 1 : i32
    %5 = arith.cmpi slt, %1, %c1_i32_1 : i32
    %6 = arith.extui %5 : i1 to i32
    %c0_i32_2 = arith.constant 0 : i32
    %7 = arith.cmpi ne, %6, %c0_i32_2 : i32
    scf.if %7 {
      %c0 = arith.constant 0 : index
      %c0_5 = arith.constant 0 : index
      %11 = vector.load %arg2[%c0, %c0_5] : memref<16x128xf32, #tpu.memory_space<vmem>>, vector<16x128xf32>
      %c0_6 = arith.constant 0 : index
      %c0_7 = arith.constant 0 : index
      %12 = vector.load %arg3[%c0_6, %c0_7] : memref<16x128xbf16, #tpu.memory_space<vmem>>, vector<16x128xbf16>
      %13 = arith.extf %12 : vector<16x128xbf16> to vector<16x128xf32>
      %cst = arith.constant 2.000000e+00 : f32
      %14 = vector.broadcast %cst : f32 to vector<16x128xf32>
      %15 = arith.addf %13, %14 : vector<16x128xf32>
      %16 = math.absf %11 : vector<16x128xf32>
      %cst_8 = arith.constant 0.000000e+00 : f32
      %17 = vector.broadcast %cst_8 : f32 to vector<16x128xf32>
      %18 = arith.subf %17, %16 : vector<16x128xf32>
      %19 = math.exp %18 : vector<16x128xf32>
      %20 = math.log1p %19 : vector<16x128xf32>
      %21 = arith.mulf %11, %13 : vector<16x128xf32>
      %22 = arith.subf %11, %21 : vector<16x128xf32>
      %cst_9 = arith.constant 0.000000e+00 : f32
      %23 = vector.broadcast %cst_9 : f32 to vector<16x128xf32>
      %24 = arith.subf %23, %11 : vector<16x128xf32>
      %cst_10 = arith.constant 0.000000e+00 : f32
      %25 = vector.broadcast %cst_10 : f32 to vector<16x128xf32>
      %26 = arith.maximumf %24, %25 : vector<16x128xf32>
      %27 = arith.addf %22, %26 : vector<16x128xf32>
      %28 = arith.addf %27, %20 : vector<16x128xf32>
      %cst_11 = arith.constant 2.000000e+00 : f32
      %29 = vector.broadcast %cst_11 : f32 to vector<16x128xf32>
      %30 = arith.mulf %13, %29 : vector<16x128xf32>
      %cst_12 = arith.constant 1.000000e+00 : f32
      %31 = vector.broadcast %cst_12 : f32 to vector<16x128xf32>
      %32 = arith.subf %30, %31 : vector<16x128xf32>
      %33 = arith.mulf %11, %32 : vector<16x128xf32>
      %cst_13 = arith.constant 0.000000e+00 : f32
      %34 = vector.broadcast %cst_13 : f32 to vector<16x128xf32>
      %35 = arith.cmpf ogt, %33, %34 : vector<16x128xf32>
      %cst_14 = arith.constant 1.000000e+00 : f32
      %36 = vector.broadcast %cst_14 : f32 to vector<16x128xf32>
      %37 = arith.select %35, %19, %36 : vector<16x128xi1>, vector<16x128xf32>
      %cst_15 = arith.constant 1.000000e+00 : f32
      %38 = vector.broadcast %cst_15 : f32 to vector<16x128xf32>
      %39 = arith.addf %38, %19 : vector<16x128xf32>
      %40 = arith.divf %37, %39 : vector<16x128xf32>
      %41 = arith.mulf %40, %40 : vector<16x128xf32>
      %42 = arith.mulf %41, %28 : vector<16x128xf32>
      %43 = arith.mulf %42, %15 : vector<16x128xf32>
      %c0_16 = arith.constant 0 : index
      %c0_17 = arith.constant 0 : index
      %44 = vector.load %arg5[%c0_16, %c0_17] : memref<8x128xf32, #tpu.memory_space<vmem>>, vector<8x128xf32>
      %45 = vector.shape_cast %43 : vector<16x128xf32> to vector<2x8x128xf32>
      %cst_18 = arith.constant dense<0.000000e+00> : vector<8x128xf32>
      %46 = vector.multi_reduction <add>, %45, %cst_18 [0] : vector<2x8x128xf32> to vector<8x128xf32>
      %47 = arith.addf %44, %46 : vector<8x128xf32>
      %c0_19 = arith.constant 0 : index
      %c0_20 = arith.constant 0 : index
      %48 = vector.load %arg5[%c0_19, %c0_20] : memref<8x128xf32, #tpu.memory_space<vmem>>, vector<8x128xf32>
      tpu.vector_store %arg5[%c0_19, %c0_20], %47 {strides = array<i32>} : memref<8x128xf32, #tpu.memory_space<vmem>>, vector<8x128xf32>,
    } else {
    }
    %c0_i32_3 = arith.constant 0 : i32
    %8 = arith.cmpi eq, %arg1, %c0_i32_3 : i32
    %9 = arith.extui %8 : i1 to i32
    %c0_i32_4 = arith.constant 0 : i32
    %10 = arith.cmpi ne, %9, %c0_i32_4 : i32
    scf.if %10 {
      %c0 = arith.constant 0 : index
      %c0_5 = arith.constant 0 : index
      %11 = vector.load %arg5[%c0, %c0_5] : memref<8x128xf32, #tpu.memory_space<vmem>>, vector<8x128xf32>
      %12 = vector.shape_cast %11 : vector<8x128xf32> to vector<1x8x128xf32>
      %cst = arith.constant dense<0.000000e+00> : vector<1xf32>
      %13 = vector.multi_reduction <add>, %12, %cst [1, 2] : vector<1x8x128xf32> to vector<1xf32>
      %14 = vector.shape_cast %13 : vector<1xf32> to vector<1x1x1xf32>
      %15 = vector.extract %14[0, 0, 0] : f32 from vector<1x1x1xf32>
      %c0_6 = arith.constant 0 : index
      %c0_7 = arith.constant 0 : index
      %16 = memref.load %arg4[%c0_6, %c0_7] : memref<1x1xf32, #tpu.memory_space<smem>>
      memref.store %15, %arg4[%c0_6, %c0_7] : memref<1x1xf32, #tpu.memory_space<smem>>
    } else {
    }
    return
  }
  func.func @transform_0(%arg0: i32, %arg1: i32) -> (i32, i32) {
    %c1_i32 = arith.constant 1 : i32
    %0 = arith.muli %arg0, %c1_i32 : i32
    %1 = arith.addi %0, %arg1 : i32
    %c0_i32 = arith.constant 0 : i32
    %2 = arith.minsi %1, %c0_i32 : i32
    %c0_i32_0 = arith.constant 0 : i32
    %c0_i32_1 = arith.constant 0 : i32
    return %2, %c0_i32_0 : i32, i32
  }
  func.func @transform_1(%arg0: i32, %arg1: i32) -> (i32, i32) {
    %c1_i32 = arith.constant 1 : i32
    %0 = arith.muli %arg0, %c1_i32 : i32
    %1 = arith.addi %0, %arg1 : i32
    %c0_i32 = arith.constant 0 : i32
    %2 = arith.minsi %1, %c0_i32 : i32
    %c0_i32_0 = arith.constant 0 : i32
    %c0_i32_1 = arith.constant 0 : i32
    return %2, %c0_i32_0 : i32, i32
  }
  func.func @transform_2(%arg0: i32, %arg1: i32) -> (i32, i32) {
    %c0_i32 = arith.constant 0 : i32
    %c0_i32_0 = arith.constant 0 : i32
    return %arg0, %c0_i32 : i32, i32
  }
}

</mosaic_0001>

<bundles_post_ra>
// kernel: tpu_custom_call.1
= control target key start
LH: loop header
LB: loop body
LE: loop exit
PB: predicated region body
PF: predicated region fallthrough
CT: control target
= control target key end

     0   :  { %7 = vsyncpa [#allocation4], 0  ;;  %s288_s0 = inlined_call_operand.hbm [shape: f32[16,128], index: 0, kind: input, shape index: {}]   ;;  %s289_s1 = inlined_call_operand.hbm [shape: bf16[16,128], index: 1, kind: input, shape index: {}]   ;;  %s290_s2 = inlined_call_operand.hbm [shape: f32[1,1], index: 2, kind: output, shape index: {}]  }
   0x1   :  { %8 = vsyncpa [#allocation7], 0 }
   0x2   :  { %9 = vsyncpa [#allocation5], 0  ;;  %s257_s9 = smov [#allocation3]  }
   0x3   :  { %s21_s10 = sshll.u32 %s257_s9, 4  ;;  %s22_s10 = int_to_ptr.vmem [resolvable:$true] %s21_s10 }
   0x4   :  { %s211_s11 = scalar_lea.vmem %s22_s10, 256  ;;  %p216_p1 = scmp.lt.s32.totalorder %s22_s10, %s22_s10 }
   0x5   :  { %p212_p0 = scmp.ne.s32.totalorder %s22_s10, %s211_s11  ;;  %p217_p2 = scmp.lt.s32.totalorder %s211_s11, %s211_s11 }
   0x7   :  { %p218_p3 = por %p217_p2, %p216_p1 }
   0x9   :  { %p219_p4 = pnand %p218_p3, %p212_p0 }
   0xb   :  { %222 = shalt.err (!%p219_p4)
}
   0xc   :  { %s258_s12 = smov 128   ;;  %s259_s13 = smov 8  }
   0xd   :  { %27 = dma.hbm_to_vmem [thread:$0]  %s288_s0, 256, %s22_s10, [#allocation4], %s258_s12, %s258_s12, %s259_s13  }
   0xe   :  { %s260_s16 = smov [#allocation6]  }
   0xf   :  { %s39_s17 = sshll.u32 %s260_s16, 4  ;;  %s40_s17 = int_to_ptr.vmem [resolvable:$true] %s39_s17 }
  0x10   :  { %s231_s18 = scalar_lea.vmem %s40_s17, 128  ;;  %p236_p6 = scmp.lt.s32.totalorder %s40_s17, %s40_s17 }
  0x11   :  { %p232_p5 = scmp.ne.s32.totalorder %s40_s17, %s231_s18  ;;  %p237_p7 = scmp.lt.s32.totalorder %s231_s18, %s231_s18 }
  0x13   :  { %p238_p8 = por %p237_p7, %p236_p6 }
  0x15   :  { %p239_p9 = pnand %p238_p8, %p232_p5 }
  0x17   :  { %242 = shalt.err (!%p239_p9)
}
  0x18   :  { %s261_s19 = smov 64   ;;  %s262_s20 = smov 4  }
  0x19   :  { %45 = dma.hbm_to_vmem [thread:$0]  %s289_s1, 128, %s40_s17, [#allocation7], %s261_s19, %s261_s19, %s262_s20  }
  0x1a   :  { %251 = dma.done.wait [#allocation4], 256  }
  0x1b   :  { %252 = vsyncadd [#allocation4], 4294967040 }
  0x1c   :  { %253 = dma.done.wait [#allocation7], 128  }
  0x1d   :  { %254 = vsyncadd [#allocation7], 4294967168  ;;  %v70_v0 = vld [vmem:[#allocation3] sm:$0xff]  ;;  %v71_v1 = vld [vmem:[#allocation3 + $0x8] sm:$0xff]  ;;  %s263_s1 = smov [#allocation8]  }
  0x1e   :  { %v78_v2 = vand.u32 2147483647, %v70_v0  ;;  %v79_v3 = vand.u32 2147483647, %v71_v1  ;;  %v179_v8 = vld [vmem:[#allocation6] sm:$0xff]   ;;  %v108_v22 = vsub.f32 0.0, %v70_v0 }
  0x1f   :  { %v180_v9 = vunpack.c.l.bf16 %v179_v8  ;;  %v181_v10 = vunpack.c.h.bf16 %v179_v8  ;;  %v109_v24 = vsub.f32 0.0, %v71_v1 }
  0x20   :  { %v80_v4 = vsub.f32 0.0, %v78_v2  ;;  %v81_v5 = vsub.f32 0.0, %v79_v3  ;;  %v110_v31 = vmax.f32 %v108_v22, 0.0 }
  0x21   :  { %v116_v14 = vmul.f32 2.0, %v180_v9  ;;  %v117_v16 = vmul.f32 2.0, %v181_v10  ;;  %v104_v21 = vmul.f32 %v180_v9, %v70_v0  ;;  %v105_v23 = vmul.f32 %v181_v10, %v71_v1 }
  0x22   :  { %v82_v6 = vmul.f32 1.442695, %v80_v4  ;;  %v84_v7 = vmul.f32 1.442695, %v81_v5  ;;  %v111_v34 = vmax.f32 %v109_v24, 0.0  ;;  %v76_v52 = vadd.f32 2.0, %v180_v9 }
  0x23   :  { %v176_v17 = vadd.f32 -1.0, %v116_v14  ;;  %v177_v18 = vadd.f32 -1.0, %v117_v16  ;;  %v106_v30 = vsub.f32 %v70_v0, %v104_v21  ;;  %v107_v33 = vsub.f32 %v71_v1, %v105_v23 }
  0x24   :  { %191 = vpow2.f32 %v82_v6  ;;  %v77_v55 = vadd.f32 2.0, %v181_v10 }
  0x25   :  { %193 = vpow2.f32 %v84_v7  ;;  %v120_v25 = vmul.f32 %v176_v17, %v70_v0  ;;  %v121_v26 = vmul.f32 %v177_v18, %v71_v1  ;;  %v112_v38 = vadd.f32 %v110_v31, %v106_v30 }
  0x26   :  { %v113_v42 = vadd.f32 %v111_v34, %v107_v33 }
  0x27   :  { %vm122_vm0 = vcmp.gt.f32.partialorder %v120_v25, 0.0  ;;  %vm123_vm1 = vcmp.gt.f32.partialorder %v121_v26, 0.0 }
  0x31   :  { %v192_v11 = vpop.eup %191 }
  0x32   :  { %v194_v12 = vpop.eup %193  ;;  %v86_v13 = vadd.f32 1.0, %v192_v11  ;;  %v89_v19 = vmul.f32 -0.5, %v192_v11  ;;  %v92_v28 = vand.u32 2147483647, %v192_v11  ;;  %v124_v39 = vsel %vm122_vm0, %v192_v11, 1.0 }
  0x33   :  { %v95_v15 = vadd.f32 1.0, %v194_v12  ;;  %v98_v20 = vmul.f32 -0.5, %v194_v12  ;;  %v101_v32 = vand.u32 2147483647, %v194_v12  ;;  %v125_v43 = vsel %vm123_vm1, %v194_v12, 1.0 }
  0x34   :  { %195 = vlog2.f32 %v86_v13  ;;  %v90_v27 = vadd.f32 1.0, %v89_v19  ;;  %vm93_vm2 = vcmp.lt.f32.partialorder %v92_v28, 0.0004427343 }
  0x35   :  { %197 = vlog2.f32 %v95_v15  ;;  %v99_v29 = vadd.f32 1.0, %v98_v20  ;;  %vm102_vm3 = vcmp.lt.f32.partialorder %v101_v32, 0.0004427343 }
  0x36   :  { %199 = vrcp.f32 %v86_v13  ;;  %v91_v35 = vmul.f32 %v192_v11, %v90_v27 }
  0x37   :  { %201 = vrcp.f32 %v95_v15  ;;  %v100_v37 = vmul.f32 %v194_v12, %v99_v29 }
  0x41   :  { %v196_v36 = vpop.eup %195 }
  0x42   :  { %v198_v40 = vpop.eup %197  ;;  %v88_v41 = vmul.f32 0.6931472, %v196_v36 }
  0x43   :  { %v200_v44 = vpop.eup %199  ;;  %v97_v45 = vmul.f32 0.6931472, %v198_v40 }
  0x44   :  { %v202_v46 = vpop.eup %201  ;;  %v94_v47 = vsel %vm93_vm2, %v91_v35, %v88_v41  ;;  %v129_v48 = vmul.f32 %v200_v44, %v124_v39 }
  0x45   :  { %v103_v49 = vsel %vm102_vm3, %v100_v37, %v97_v45  ;;  %v114_v50 = vadd.f32 %v112_v38, %v94_v47  ;;  %v131_v51 = vmul.f32 %v202_v46, %v125_v43 }
  0x46   :  { %v115_v53 = vadd.f32 %v113_v42, %v103_v49  ;;  %v132_v54 = vmul.f32 %v129_v48, %v129_v48 }
  0x47   :  { %v133_v56 = vmul.f32 %v131_v51, %v131_v51 }
  0x48   :  { %v134_v57 = vmul.f32 %v132_v54, %v114_v50 }
  0x49   :  { %v135_v58 = vmul.f32 %v133_v56, %v115_v53 }
  0x4a   :  { %v136_v59 = vmul.f32 %v134_v57, %v76_v52 }
  0x4b   :  { %v137_v60 = vmul.f32 %v135_v58, %v77_v55 }
  0x4d   :  { %v139_v61 = vadd.f32 %v137_v60, %v136_v59 }
  0x4f   :  { %146 = vadd.xlane.f32.xlu0 %v139_v61 }
  0xd8   :  { %v147_v62 = vpop.xlane.xlu0 %146 }
  0xd9   :  { %v148_v63 = vrot.slane %v147_v62, 4 }
  0xdb   :  { %v149_v0 = vadd.f32 %v148_v63, %v147_v62 }
  0xdd   :  { %v150_v1 = vrot.slane %v149_v0, 2 }
  0xdf   :  { %v151_v2 = vadd.f32 %v150_v1, %v149_v0 }
  0xe1   :  { %v152_v3 = vrot.slane %v151_v2, 1 }
  0xe3   :  { %v153_v4 = vadd.f32 %v152_v3, %v151_v2 }
  0xe5   :  { %182 = vpush %v153_v4 }
 0x116   :  { %s183_s0 = spop %182 }
 0x117   :  { %156 = sst [smem:[#allocation8]] %s183_s0 }
 0x118   :  { %164 = dma.smem_to_hbm %s263_s1, 16, %s290_s2, [#allocation5]  }
 0x119   :  { %255 = dma.done.wait [#allocation5], 16  }
 0x11a   :  { %256 = vsyncadd [#allocation5], 4294967280 }
 0x11b   :  { %168 = sfence }
 0x11c   :  { %169 = vsyncpa [#allocation4], 1 }
 0x11d   :  { %170 = vsyncpa [#allocation7], 1 }
 0x11e   :  { %171 = vsyncpa [#allocation5], 1 }

</bundles_post_ra>
